<compile_context>
chip_gen: v6e
topology: v6e:2x2x1
jax: 0.10.0
libtpu: 0.0.40
codegen_flags: <defaults>
</compile_context>

<pallas_src>
import functools

import jax
import jax.numpy as jnp
from jax import lax
from jax.experimental import pallas as pl
from jax.experimental.pallas import tpu as pltpu


def _self_attention_kernel(x_ref, wqkv_ref, wo_ref, bo_ref, o_ref, *,
                           heads, k, t, b_tile, mask):
    """One batch-tile per grid step.

    x_ref    : (b_tile*t, k)   bf16, rows = (local batch, time) flattened
    wqkv_ref : (3*heads, k, k) bf16 [g, out_feature, in_feature]; q slabs carry the
                               1/sqrt(k) logit scale, v slabs the 1/k**0.25 value scale
    wo_ref   : (heads, k, k)   bf16 per-head slice of the unifying projection
    bo_ref   : (1, k)          f32
    o_ref    : (b_tile*t, k)   f32
    """
    g = 3 * heads
    m = b_tile * t

    x = x_ref[...]                                            # (m, k) bf16

    # ---- fused, head-batched Q/K/V projection (bf16 MXU, f32 accumulation) ----
    # TODO(synk): the broadcast-free form einsum('md,gcd->gmc') lowers to a 2D-x-3D
    # dot_general plus a (1,0,2) result transpose, neither of which Mosaic's
    # dot_general / transpose rules support; keep the batched form with a bf16
    # replicated operand instead (half the bytes of the previous f32 broadcast).
    xb = jnp.broadcast_to(x[None, :, :], (g, m, k))           # (3h, m, k) bf16
    qkv = jnp.einsum('gmd,gcd->gmc', xb, wqkv_ref[...],
                     preferred_element_type=jnp.float32)      # (3h, m, k) f32

    q = qkv[0:heads]                                          # leading-dim slices (cheap)
    kk = qkv[heads:2 * heads]
    v = qkv[2 * heads:3 * heads]

    # Fold the batch tile into the head-batch axis so attention never mixes batch
    # elements; t % 8 == 0 keeps these reshapes sublane-aligned (minor dim unchanged).
    hb = heads * b_tile
    q3 = q.reshape(hb, t, k)
    k3 = kk.reshape(hb, t, k)
    v3 = v.reshape(hb, t, k)

    # ---- scaled dot-product attention (scales already folded into the weights) ----
    scores = jnp.einsum('bqd,bkd->bqk',
                        q3.astype(jnp.bfloat16), k3.astype(jnp.bfloat16),
                        preferred_element_type=jnp.float32)   # (hb, t, t) f32

    if mask:  # static flag; mask computed once for all heads / batch elements
        row = lax.broadcasted_iota(jnp.int32, (t, t), 0)
        col = lax.broadcasted_iota(jnp.int32, (t, t), 1)
        neg = jnp.float32(-1e30)   # finite -> no inf-inf NaN even on fully-masked rows
        scores = jnp.where((col > row)[None, :, :], neg, scores)

    s_max = jnp.max(scores, axis=-1, keepdims=True)           # f32 softmax
    p = jnp.exp(scores - s_max)
    denom = jnp.sum(p, axis=-1, keepdims=True)
    w = p * pl.reciprocal(denom, approx=True)                 # EUP vrcp (free slot)

    ctx = jnp.einsum('bqk,bkd->bqd',
                     w.astype(jnp.bfloat16), v3.astype(jnp.bfloat16),
                     preferred_element_type=jnp.float32)      # (hb, t, k) f32

    # ---- unify heads: head-batched matmul + reduction over the head axis ----
    # TODO(synk): the fully fused depth-128 contraction 'hmd,hcd->mc' needs a
    # dot_general with two contracting dims (or a heads->lane relayout), which Mosaic
    # does not lower; keep the batched per-head matmul and a (heads-1)-add VPU
    # reduction (negligible next to the matmuls at these shapes).
    ctx_h = ctx.reshape(heads, m, k)                          # (h, m, k)
    out_h = jnp.einsum('hmd,hcd->hmc',
                       ctx_h.astype(jnp.bfloat16), wo_ref[...],
                       preferred_element_type=jnp.float32)    # (h, m, k) f32
    out = jnp.sum(out_h, axis=0) + bo_ref[...]                # (m, k) + (1, k)

    # TODO(synk): lane-dense (b_tile, t*k) output packing requires an in-kernel
    # minor-dim reshape ((m,k)->(b_tile,t*k)) that Mosaic's vector shape_cast does not
    # support at k=32; the store stays (m, k) with masked lanes.
    o_ref[...] = out.astype(o_ref.dtype)


def _pick_b_tile(b, t, *, max_rows=1024, sublane=16):
    """Largest divisor of b with b_tile*t <= max_rows, keeping the (m, k) bf16 block
    sublane-aligned whenever the grid has more than one step."""
    feasible = []
    for cand in range(1, b + 1):
        if b % cand:
            continue
        m = cand * t
        if m <= max_rows and (cand == b or m % sublane == 0):
            feasible.append(cand)
    return max(feasible) if feasible else b


def pack_self_attention_params(wq, wk, wv, wo, bo, *, heads, mxu_dtype=jnp.bfloat16):
    """One-time parameter packing (do at module init, NOT per forward call).
    PyTorch nn.Linear convention: wq/wk/wv: (heads*k, k), wo: (k, heads*k), bo: (k,)."""
    hk, k = wq.shape
    assert hk == heads * k
    wq_h = wq.reshape(heads, k, k).astype(jnp.float32) * (k ** -0.5)    # logit scale
    wk_h = wk.reshape(heads, k, k).astype(jnp.float32)
    wv_h = wv.reshape(heads, k, k).astype(jnp.float32) * (k ** -0.25)   # value scale
    wqkv = jnp.concatenate([wq_h, wk_h, wv_h], axis=0).astype(mxu_dtype)  # (3h, k, k)
    # unifyheads weight: (k, h*k) -> (h, k_out, k_in_of_that_head)
    wo_h = jnp.transpose(wo.reshape(k, heads, k), (1, 0, 2)).astype(mxu_dtype)
    bo2 = bo.reshape(1, k).astype(jnp.float32)
    return wqkv, wo_h, bo2


@functools.partial(jax.jit, static_argnames=("heads", "mask", "b_tile"))
def self_attention_packed(x, wqkv, wo_h, bo2, *, heads, mask=False, b_tile=None):
    """x: (b, t, k) f32; wqkv/wo_h/bo2 from pack_self_attention_params."""
    b, t, k = x.shape
    assert t % 8 == 0, "t must be a multiple of 8 for sublane-aligned head reshapes"
    g = 3 * heads

    if b_tile is None:
        b_tile = _pick_b_tile(b, t)
    assert b % b_tile == 0
    m = b_tile * t
    grid = b // b_tile
    # TODO(synk): on v7x prefer b_tile such that grid >= 2 to occupy both TensorCores;
    # at the demo shape (b=2, t=8) the bf16 sublane constraint forces one full-batch tile.

    x2 = x.reshape(b * t, k).astype(jnp.bfloat16)   # fold (b, t) into the matmul M axis

    # --- advisory cost + explicit VMEM budget ---
    flops = (2 * b * t * k * g * k                    # QKV projection
             + 2 * (b * heads) * t * t * k * 2        # scores + probs @ values
             + 2 * b * t * heads * k * k)             # unify heads
    transcendentals = b * heads * t * t + b * heads * t
    bytes_accessed = (b * t * k * 2 + (g + heads) * k * k * 2 + k * 4 + b * t * k * 4)
    cost = pl.CostEstimate(flops=flops, transcendentals=transcendentals,
                           bytes_accessed=bytes_accessed)

    inter = (g * m * k + heads * m * k + 2 * heads * b_tile * t * t) * 4
    vmem_need = 2 * (m * k * 2 + m * k * 4) + (g + heads) * k * k * 2 + k * 4 + inter
    vmem_limit = int(min(48 * 2 ** 20, max(16 * 2 ** 20, 4 * vmem_need)))

    kernel = functools.partial(_self_attention_kernel, heads=heads, k=k, t=t,
                               b_tile=b_tile, mask=mask)

    out2 = pl.pallas_call(
        kernel,
        out_shape=jax.ShapeDtypeStruct((b * t, k), jnp.float32),
        grid=(grid,),
        in_specs=[
            pl.BlockSpec((m, k), lambda i: (i, 0)),            # x rows of this batch tile
            pl.BlockSpec((g, k, k), lambda i: (0, 0, 0)),      # fused QKV weight stack
            pl.BlockSpec((heads, k, k), lambda i: (0, 0, 0)),  # unify weights
            pl.BlockSpec((1, k), lambda i: (0, 0)),            # unify bias
        ],
        out_specs=pl.BlockSpec((m, k), lambda i: (i, 0)),
        compiler_params=pltpu.CompilerParams(
            dimension_semantics=("parallel",),
            vmem_limit_bytes=vmem_limit),
        cost_estimate=cost,
    )(x2, wqkv, wo_h, bo2)

    return out2.reshape(b, t, k)


def self_attention(x, wq, wk, wv, wo, bo, *, heads, mask=False, b_tile=None):
    """Convenience wrapper (packs per call; prefer packing once + self_attention_packed)."""
    wqkv, wo_h, bo2 = pack_self_attention_params(wq, wk, wv, wo, bo, heads=heads)
    return self_attention_packed(x, wqkv, wo_h, bo2, heads=heads, mask=mask, b_tile=b_tile)


def self_attention_ref(x, wq, wk, wv, wo, bo, *, heads, mask=False):
    """Pure-JAX reference reproducing the PyTorch forward exactly (f32)."""
    b, t, k = x.shape
    h = heads
    queries = (x @ wq.T).reshape(b, t, h, k)
    keys = (x @ wk.T).reshape(b, t, h, k)
    values = (x @ wv.T).reshape(b, t, h, k)
    queries = jnp.transpose(queries, (0, 2, 1, 3)).reshape(b * h, t, k)
    keys = jnp.transpose(keys, (0, 2, 1, 3)).reshape(b * h, t, k)
    values = jnp.transpose(values, (0, 2, 1, 3)).reshape(b * h, t, k) / (k ** 0.25)
    weights = jnp.einsum('bqd,bkd->bqk', queries, keys) / (k ** 0.5)
    if mask:
        row = jnp.arange(t)[:, None]
        col = jnp.arange(t)[None, :]
        weights = jnp.where(col > row, -jnp.inf, weights)
    weights = jax.nn.softmax(weights, axis=2)
    out = jnp.einsum('bqk,bkd->bqd', weights, values).reshape(b, h, t, k)
    out = jnp.transpose(out, (0, 2, 1, 3)).reshape(b, t, h * k)
    return out @ wo.T + bo


if __name__ == "__main__":
    b, t, k, heads = 2, 8, 32, 4
    hk = heads * k

    key = jax.random.PRNGKey(0)
    kx, kq, kkk, kv, kwo, kbo = jax.random.split(key, 6)

    x = jax.random.normal(kx, (b, t, k), dtype=jnp.float32)
    # Parameter shapes follow nn.Linear: (out_features, in_features).
    wq = jax.random.normal(kq, (hk, k), dtype=jnp.float32) * 0.1
    wk = jax.random.normal(kkk, (hk, k), dtype=jnp.float32) * 0.1
    wv = jax.random.normal(kv, (hk, k), dtype=jnp.float32) * 0.1
    wo = jax.random.normal(kwo, (k, hk), dtype=jnp.float32) * 0.1
    bo = jax.random.normal(kbo, (k,), dtype=jnp.float32) * 0.1

    # Pack once (module init); the jitted hot path only sees pre-packed bf16 stacks.
    wqkv, wo_h, bo2 = pack_self_attention_params(wq, wk, wv, wo, bo, heads=heads)

    for use_mask in (False, True):
        out = self_attention_packed(x, wqkv, wo_h, bo2, heads=heads, mask=use_mask)
        out = jax.block_until_ready(out)
        ref = self_attention_ref(x, wq, wk, wv, wo, bo, heads=heads, mask=use_mask)
        assert out.shape == (b, t, k)
        # Tolerance accounts for bf16 MXU operands + pl.reciprocal(approx=True).
        assert jnp.allclose(out, ref, atol=2e-2, rtol=2e-2), \
            f"mismatch vs reference (mask={use_mask})"

    print("KERNEL_OK")
</pallas_src>

<mosaic_0001>
module attributes {stable_mosaic.version = 11 : i64} {
  func.func @_self_attention_kernel(%arg0: i32, %arg1: memref<16x32xbf16, #tpu.memory_space<vmem>>, %arg2: memref<12x32x32xbf16, #tpu.memory_space<vmem>>, %arg3: memref<4x32x32xbf16, #tpu.memory_space<vmem>>, %arg4: memref<1x32xf32, #tpu.memory_space<vmem>>, %arg5: memref<16x32xf32, #tpu.memory_space<vmem>>) attributes {dimension_semantics = [#tpu.dimension_semantics<parallel>], iteration_bounds = array<i64: 1>, scalar_prefetch = 0 : i64, scratch_operands = 0 : i64, tpu.core_type = #tpu.core_type<tc>, window_params = [{transform_indices = @transform_0, window_bounds = array<i64: 16, 32>}, {pipeline_mode = #tpu.pipeline_mode<synchronous>, transform_indices = @transform_1, window_bounds = array<i64: 12, 32, 32>}, {pipeline_mode = #tpu.pipeline_mode<synchronous>, transform_indices = @transform_2, window_bounds = array<i64: 4, 32, 32>}, {pipeline_mode = #tpu.pipeline_mode<synchronous>, transform_indices = @transform_3, window_bounds = array<i64: 1, 32>}, {transform_indices = @transform_4, window_bounds = array<i64: 16, 32>}]} {
    %c0 = arith.constant 0 : index
    %c0_0 = arith.constant 0 : index
    %0 = vector.load %arg1[%c0, %c0_0] : memref<16x32xbf16, #tpu.memory_space<vmem>>, vector<16x32xbf16>
    %1 = vector.shape_cast %0 : vector<16x32xbf16> to vector<1x16x32xbf16>
    %2 = vector.shape_cast %1 : vector<1x16x32xbf16> to vector<1x16x32xbf16>
    %3 = vector.broadcast %2 : vector<1x16x32xbf16> to vector<12x16x32xbf16>
    %c0_1 = arith.constant 0 : index
    %c0_2 = arith.constant 0 : index
    %c0_3 = arith.constant 0 : index
    %4 = vector.load %arg2[%c0_1, %c0_2, %c0_3] : memref<12x32x32xbf16, #tpu.memory_space<vmem>>, vector<12x32x32xbf16>
    "tpu.trace_start"() <{level = 10 : i32, message = "gmd,gcd->gmc"}> : () -> ()
    %cst = arith.constant dense<0.000000e+00> : vector<12x16x32xf32>
    %5 = tpu.matmul %3, %4, %cst {dimension_numbers = #tpu.dot_dimension_numbers<[2], [2], [1], [1], [0, 0, 0, 1, 1, 1], [0], [0]>} : vector<12x16x32xbf16>, vector<12x32x32xbf16>, vector<12x16x32xf32> -> vector<12x16x32xf32>
    "tpu.trace_stop"() : () -> ()
    %6 = vector.extract_strided_slice %5 {offsets = [0, 0, 0], sizes = [4, 16, 32], strides = [1, 1, 1]} : vector<12x16x32xf32> to vector<4x16x32xf32>
    %7 = vector.extract_strided_slice %5 {offsets = [4, 0, 0], sizes = [4, 16, 32], strides = [1, 1, 1]} : vector<12x16x32xf32> to vector<4x16x32xf32>
    %8 = vector.extract_strided_slice %5 {offsets = [8, 0, 0], sizes = [4, 16, 32], strides = [1, 1, 1]} : vector<12x16x32xf32> to vector<4x16x32xf32>
    %9 = vector.shape_cast %6 : vector<4x16x32xf32> to vector<8x8x32xf32>
    %10 = vector.shape_cast %7 : vector<4x16x32xf32> to vector<8x8x32xf32>
    %11 = vector.shape_cast %8 : vector<4x16x32xf32> to vector<8x8x32xf32>
    %12 = arith.truncf %9 : vector<8x8x32xf32> to vector<8x8x32xbf16>
    %13 = arith.truncf %10 : vector<8x8x32xf32> to vector<8x8x32xbf16>
    "tpu.trace_start"() <{level = 10 : i32, message = "bqd,bkd->bqk"}> : () -> ()
    %cst_4 = arith.constant dense<0.000000e+00> : vector<8x8x8xf32>
    %14 = tpu.matmul %12, %13, %cst_4 {dimension_numbers = #tpu.dot_dimension_numbers<[2], [2], [1], [1], [0, 0, 0, 1, 1, 1], [0], [0]>} : vector<8x8x32xbf16>, vector<8x8x32xbf16>, vector<8x8x8xf32> -> vector<8x8x8xf32>
    "tpu.trace_stop"() : () -> ()
    %cst_5 = arith.constant dense<0xFF800000> : vector<8x8xf32>
    %15 = vector.multi_reduction <maximumf>, %14, %cst_5 [2] : vector<8x8x8xf32> to vector<8x8xf32>
    %16 = vector.shape_cast %15 : vector<8x8xf32> to vector<8x8x1xf32>
    %17 = vector.broadcast %16 : vector<8x8x1xf32> to vector<8x8x8xf32>
    %18 = arith.subf %14, %17 : vector<8x8x8xf32>
    %19 = math.exp %18 : vector<8x8x8xf32>
    %cst_6 = arith.constant dense<0.000000e+00> : vector<8x8xf32>
    %20 = vector.multi_reduction <add>, %19, %cst_6 [2] : vector<8x8x8xf32> to vector<8x8xf32>
    %21 = vector.shape_cast %20 : vector<8x8xf32> to vector<8x8x1xf32>
    %22 = tpu.reciprocal %21 {approx = true} : vector<8x8x1xf32> -> vector<8x8x1xf32>
    %23 = vector.broadcast %22 : vector<8x8x1xf32> to vector<8x8x8xf32>
    %24 = arith.mulf %19, %23 : vector<8x8x8xf32>
    %25 = arith.truncf %24 : vector<8x8x8xf32> to vector<8x8x8xbf16>
    %26 = arith.truncf %11 : vector<8x8x32xf32> to vector<8x8x32xbf16>
    "tpu.trace_start"() <{level = 10 : i32, message = "bqk,bkd->bqd"}> : () -> ()
    %cst_7 = arith.constant dense<0.000000e+00> : vector<8x8x32xf32>
    %27 = tpu.matmul %25, %26, %cst_7 {dimension_numbers = #tpu.dot_dimension_numbers<[2], [1], [1], [2], [0, 0, 0, 1, 1, 2], [0], [0]>} : vector<8x8x8xbf16>, vector<8x8x32xbf16>, vector<8x8x32xf32> -> vector<8x8x32xf32>
    "tpu.trace_stop"() : () -> ()
    %28 = vector.shape_cast %27 : vector<8x8x32xf32> to vector<4x16x32xf32>
    %29 = arith.truncf %28 : vector<4x16x32xf32> to vector<4x16x32xbf16>
    %c0_8 = arith.constant 0 : index
    %c0_9 = arith.constant 0 : index
    %c0_10 = arith.constant 0 : index
    %30 = vector.load %arg3[%c0_8, %c0_9, %c0_10] : memref<4x32x32xbf16, #tpu.memory_space<vmem>>, vector<4x32x32xbf16>
    "tpu.trace_start"() <{level = 10 : i32, message = "hmd,hcd->hmc"}> : () -> ()
    %cst_11 = arith.constant dense<0.000000e+00> : vector<4x16x32xf32>
    %31 = tpu.matmul %29, %30, %cst_11 {dimension_numbers = #tpu.dot_dimension_numbers<[2], [2], [1], [1], [0, 0, 0, 1, 1, 1], [0], [0]>} : vector<4x16x32xbf16>, vector<4x32x32xbf16>, vector<4x16x32xf32> -> vector<4x16x32xf32>
    "tpu.trace_stop"() : () -> ()
    %cst_12 = arith.constant dense<0.000000e+00> : vector<16x32xf32>
    %32 = vector.multi_reduction <add>, %31, %cst_12 [0] : vector<4x16x32xf32> to vector<16x32xf32>
    %c0_13 = arith.constant 0 : index
    %c0_14 = arith.constant 0 : index
    %33 = vector.load %arg4[%c0_13, %c0_14] : memref<1x32xf32, #tpu.memory_space<vmem>>, vector<1x32xf32>
    %34 = vector.broadcast %33 : vector<1x32xf32> to vector<16x32xf32>
    %35 = arith.addf %32, %34 : vector<16x32xf32>
    %c0_15 = arith.constant 0 : index
    %c0_16 = arith.constant 0 : index
    %36 = vector.load %arg5[%c0_15, %c0_16] : memref<16x32xf32, #tpu.memory_space<vmem>>, vector<16x32xf32>
    tpu.vector_store %arg5[%c0_15, %c0_16], %35 {strides = array<i32>} : memref<16x32xf32, #tpu.memory_space<vmem>>, vector<16x32xf32>,
    return
  }
  func.func @transform_0(%arg0: i32) -> (i32, i32) {
    %c0_i32 = arith.constant 0 : i32
    %c0_i32_0 = arith.constant 0 : i32
    return %arg0, %c0_i32 : i32, i32
  }
  func.func @transform_1(%arg0: i32) -> (i32, i32, i32) {
    %c0_i32 = arith.constant 0 : i32
    %c0_i32_0 = arith.constant 0 : i32
    %c0_i32_1 = arith.constant 0 : i32
    %c0_i32_2 = arith.constant 0 : i32
    return %c0_i32, %c0_i32_0, %c0_i32_1 : i32, i32, i32
  }
  func.func @transform_2(%arg0: i32) -> (i32, i32, i32) {
    %c0_i32 = arith.constant 0 : i32
    %c0_i32_0 = arith.constant 0 : i32
    %c0_i32_1 = arith.constant 0 : i32
    %c0_i32_2 = arith.constant 0 : i32
    return %c0_i32, %c0_i32_0, %c0_i32_1 : i32, i32, i32
  }
  func.func @transform_3(%arg0: i32) -> (i32, i32) {
    %c0_i32 = arith.constant 0 : i32
    %c0_i32_0 = arith.constant 0 : i32
    %c0_i32_1 = arith.constant 0 : i32
    return %c0_i32, %c0_i32_0 : i32, i32
  }
  func.func @transform_4(%arg0: i32) -> (i32, i32) {
    %c0_i32 = arith.constant 0 : i32
    %c0_i32_0 = arith.constant 0 : i32
    return %arg0, %c0_i32 : i32, i32
  }
}

</mosaic_0001>

<bundles_post_ra>
// kernel: self_attention_packed.1
= control target key start
LH: loop header
LB: loop body
LE: loop exit
PB: predicated region body
PF: predicated region fallthrough
CT: control target
= control target key end

     0   :  { %9 = vsyncpa [#allocation3], 0  ;;  %s2784_s0 = inlined_call_operand.vmem [shape: bf16[16,32], index: 0, kind: input, shape index: {}]   ;;  %s2785_s1 = inlined_call_operand.hbm [shape: bf16[12,32,32], index: 1, kind: input, shape index: {}]   ;;  %s2786_s2 = inlined_call_operand.hbm [shape: bf16[4,32,32], index: 2, kind: input, shape index: {}]   ;;  %s2787_s3 = inlined_call_operand.vmem [shape: f32[1,32], index: 3, kind: input, shape index: {}]   ;;  %s2788_s4 = inlined_call_operand.hbm [shape: f32[16,32], index: 4, kind: output, shape index: {}]  }
   0x1   :  { %10 = vsyncpa [#allocation6], 0 }
   0x2   :  { %11 = vsyncpa [#allocation4], 0  ;;  %s2461_s15 = smov [#allocation2]  }
   0x3   :  { %s19_s16 = sshll.u32 %s2461_s15, 4  ;;  %s20_s16 = int_to_ptr.vmem [resolvable:$true] %s19_s16 }
   0x4   :  { %s2403_s17 = scalar_lea.vmem %s20_s16, 3072  ;;  %p2408_p1 = scmp.lt.s32.totalorder %s20_s16, %s20_s16 }
   0x5   :  { %p2404_p0 = scmp.ne.s32.totalorder %s20_s16, %s2403_s17  ;;  %p2409_p2 = scmp.lt.s32.totalorder %s2403_s17, %s2403_s17 }
   0x7   :  { %p2410_p3 = por %p2409_p2, %p2408_p1 }
   0x9   :  { %p2411_p4 = pnand %p2410_p3, %p2404_p0 }
   0xb   :  { %2414 = shalt.err (!%p2411_p4)
}
   0xc   :  { %s2462_s18 = smov 64   ;;  %s2463_s19 = smov 4  }
   0xd   :  { %25 = dma.hbm_to_vmem [thread:$0]  %s2785_s1, 3072, %s20_s16, [#allocation3], %s2462_s18, %s2462_s18, %s2463_s19  }
   0xe   :  { %s2464_s22 = smov [#allocation5]  }
   0xf   :  { %s31_s23 = sshll.u32 %s2464_s22, 4  ;;  %s32_s23 = int_to_ptr.vmem [resolvable:$true] %s31_s23 }
  0x10   :  { %s2423_s24 = scalar_lea.vmem %s32_s23, 1024  ;;  %p2428_p6 = scmp.lt.s32.totalorder %s32_s23, %s32_s23 }
  0x11   :  { %p2424_p5 = scmp.ne.s32.totalorder %s32_s23, %s2423_s24  ;;  %p2429_p7 = scmp.lt.s32.totalorder %s2423_s24, %s2423_s24 }
  0x13   :  { %p2430_p8 = por %p2429_p7, %p2428_p6 }
  0x15   :  { %p2431_p9 = pnand %p2430_p8, %p2424_p5 }
  0x17   :  { %2434 = shalt.err (!%p2431_p9)
}
  0x18   :  { %37 = dma.hbm_to_vmem [thread:$0]  %s2786_s2, 1024, %s32_s23, [#allocation6], %s2462_s18, %s2462_s18, %s2463_s19  }
  0x19   :  { %2455 = dma.done.wait [#allocation3], 3072  }
  0x1a   :  { %2456 = vsyncadd [#allocation3], 4294964224 }
  0x1b   :  { %2457 = dma.done.wait [#allocation6], 1024  }
  0x1c   :  { %2458 = vsyncadd [#allocation6], 4294966272  ;;  %v2465_v0 = vmov 0.0   ;;  %vm2466_vm0 = vmmov 0   ;;  %vm112_vm1 = vcmask 261120   ;;  %v2330_v1 = vld [vmem:[#allocation2 + $0x8] sm:$0xff]  }
  0x1d   :  { %2097 = vmatprep.subr.bf16.mxu0 %v2465_v0  ;;  %2105 = vmatprep.subr.bf16.mxu1 %v2465_v0  ;;  %v2331_v2 = vld [vmem:[#allocation2 + $0x18] sm:$0xff]   ;;  %v120_v3 = vsel %vm112_vm1, %v2330_v1, 0  ;;  %v2332_v5 = vld [vmem:[#allocation2] sm:$0xff]   ;;  %v2333_v6 = vld [vmem:[#allocation2 + $0x10] sm:$0xff]   ;;  %vm1282_vm2 = vcmask 1043456   ;;  %vm1174_vm3 = vcmask 64512  }
  0x1e   :  { %2101 = vmatprep.mubr.msk.bf16.mxu0 %vm2466_vm0, %v2465_v0  ;;  %2109 = vmatprep.mubr.msk.bf16.mxu1 %vm2466_vm0, %v2465_v0  ;;  %v177_v4 = vsel %vm112_vm1, %v2331_v2, 0  ;;  %v117_v7 = vsel %vm112_vm1, %v2332_v5, 0  ;;  %v174_v8 = vsel %vm112_vm1, %v2333_v6, 0  ;;  %v2516_v9 = vld [vmem:[%s2784_s0] sm:$0xff]   ;;  %v2335_v10 = vld [vmem:[#allocation2 + $0x28] sm:$0xff]   ;;  %v2336_v11 = vld [vmem:[#allocation2 + $0x38] sm:$0xff]  }
  0x1f   :  { %2098 = vmatpush3.bf16.xpose.msra.mxu0 %v120_v3  ;;  %2106 = vmatpush3.bf16.xpose.msra.mxu1 %v177_v4  ;;  %v2337_v12 = vld [vmem:[#allocation2 + $0x20] sm:$0xff]   ;;  %v2338_v13 = vld [vmem:[#allocation2 + $0x30] sm:$0xff]   ;;  %v234_v14 = vsel %vm112_vm1, %v2335_v10, 0  ;;  %v291_v15 = vsel %vm112_vm1, %v2336_v11, 0  ;;  %v2339_v18 = vld [vmem:[#allocation2 + $0x48] sm:$0xff]   ;;  %s2467_s28 = smov [#allocation7]  }
  0x20   :  { %2099 = vmatprep.subr.bf16.mxu0 %v2465_v0  ;;  %2107 = vmatprep.subr.bf16.mxu1 %v2465_v0  ;;  %v231_v16 = vsel %vm112_vm1, %v2337_v12, 0  ;;  %v288_v17 = vsel %vm112_vm1, %v2338_v13, 0  ;;  %v2340_v19 = vld [vmem:[#allocation2 + $0x58] sm:$0xff]   ;;  %v348_v20 = vsel %vm112_vm1, %v2339_v18, 0  ;;  %v2341_v22 = vld [vmem:[#allocation2 + $0x40] sm:$0xff]   ;;  %v2342_v23 = vld [vmem:[#allocation2 + $0x50] sm:$0xff]  }
  0x21   :  { %v405_v21 = vsel %vm112_vm1, %v2340_v19, 0  ;;  %v345_v24 = vsel %vm112_vm1, %v2341_v22, 0  ;;  %v402_v25 = vsel %vm112_vm1, %v2342_v23, 0  ;;  %v2343_v26 = vld [vmem:[#allocation2 + $0x68] sm:$0xff]   ;;  %v2344_v27 = vld [vmem:[#allocation2 + $0x78] sm:$0xff]   ;;  %v2345_v30 = vld [vmem:[#allocation2 + $0x60] sm:$0xff]  }
  0x22   :  { %v462_v28 = vsel %vm112_vm1, %v2343_v26, 0  ;;  %v519_v29 = vsel %vm112_vm1, %v2344_v27, 0  ;;  %v2346_v31 = vld [vmem:[#allocation2 + $0x70] sm:$0xff]   ;;  %v459_v32 = vsel %vm112_vm1, %v2345_v30, 0  ;;  %v2347_v34 = vld [vmem:[#allocation2 + $0x88] sm:$0xff]   ;;  %v2348_v36 = vld [vmem:[#allocation2 + $0x98] sm:$0xff]  }
  0x23   :  { %v516_v33 = vsel %vm112_vm1, %v2346_v31, 0  ;;  %v576_v35 = vsel %vm112_vm1, %v2347_v34, 0  ;;  %v633_v37 = vsel %vm112_vm1, %v2348_v36, 0  ;;  %v2349_v38 = vld [vmem:[#allocation2 + $0x80] sm:$0xff]   ;;  %v2350_v40 = vld [vmem:[#allocation2 + $0x90] sm:$0xff]   ;;  %v2351_v41 = vld [vmem:[#allocation2 + $0xa8] sm:$0xff]  }
  0x24   :  { %v573_v39 = vsel %vm112_vm1, %v2349_v38, 0  ;;  %v630_v42 = vsel %vm112_vm1, %v2350_v40, 0  ;;  %v690_v43 = vsel %vm112_vm1, %v2351_v41, 0  ;;  %v2352_v44 = vld [vmem:[#allocation2 + $0xb8] sm:$0xff]   ;;  %v2353_v46 = vld [vmem:[#allocation2 + $0xa0] sm:$0xff]   ;;  %v2354_v48 = vld [vmem:[#allocation2 + $0xb0] sm:$0xff]  }
  0x25   :  { %v747_v45 = vsel %vm112_vm1, %v2352_v44, 0  ;;  %v687_v47 = vsel %vm112_vm1, %v2353_v46, 0  ;;  %v744_v49 = vsel %vm112_vm1, %v2354_v48, 0  ;;  %s1938_s29 = sshll.u32 %s2467_s28, 4  ;;  %s1939_s29 = int_to_ptr.vmem [resolvable:$true] %s1938_s29 }
  0x26   :  { %s2435_s30 = scalar_lea.vmem %s1939_s29, 256  ;;  %p2440_p11 = scmp.lt.s32.totalorder %s1939_s29, %s1939_s29 }
  0x27   :  { %2100 = vmatpush3.bf16.xpose.msra.mxu0 %v117_v7  ;;  %2108 = vmatpush3.bf16.xpose.msra.mxu1 %v174_v8  ;;  %p2436_p10 = scmp.ne.s32.totalorder %s1939_s29, %s2435_s30  ;;  %p2441_p12 = scmp.lt.s32.totalorder %s2435_s30, %s2435_s30 }
  0x28   :  { %2113 = vmatprep.subr.bf16.mxu0 %v2465_v0  ;;  %2121 = vmatprep.subr.bf16.mxu1 %v2465_v0 }
  0x29   :  { %p2442_p13 = por %p2441_p12, %p2440_p11 }
  0x2b   :  { %p2443_p0 = pnand %p2442_p13, %p2436_p10 }
  0x2e   :  { %2102 = vmatmul.mubr.msk.bf16.vlgmr.msra.gmra.mxu0 %vm112_vm1, %v2516_v9  ;;  %2110 = vmatmul.mubr.msk.bf16.vlgmr.msra.gmra.mxu1 %vm112_vm1, %v2516_v9 }
  0x2f   :  { %2114 = vmatpush3.bf16.xpose.msra.mxu0 %v234_v14  ;;  %2122 = vmatpush3.bf16.xpose.msra.mxu1 %v291_v15 }
  0x30   :  { %2115 = vmatprep.subr.bf16.mxu0 %v2465_v0  ;;  %2123 = vmatprep.subr.bf16.mxu1 %v2465_v0 }
  0x31   :  { %2117 = vmatprep.mubr.msk.bf16.mxu0 %vm2466_vm0, %v2465_v0  ;;  %2125 = vmatprep.mubr.msk.bf16.mxu1 %vm2466_vm0, %v2465_v0 }
  0x37   :  { %2116 = vmatpush3.bf16.xpose.msra.mxu0 %v231_v16  ;;  %2124 = vmatpush3.bf16.xpose.msra.mxu1 %v288_v17 }
  0x38   :  { %2129 = vmatprep.subr.bf16.mxu0 %v2465_v0  ;;  %2137 = vmatprep.subr.bf16.mxu1 %v2465_v0 }
  0x3e   :  { %2118 = vmatmul.mubr.msk.bf16.vlgmr.msra.gmra.mxu0 %vm112_vm1, %v2516_v9  ;;  %2126 = vmatmul.mubr.msk.bf16.vlgmr.msra.gmra.mxu1 %vm112_vm1, %v2516_v9 }
  0x3f   :  { %2130 = vmatpush3.bf16.xpose.msra.mxu0 %v348_v20  ;;  %2138 = vmatpush3.bf16.xpose.msra.mxu1 %v405_v21 }
  0x40   :  { %2131 = vmatprep.subr.bf16.mxu0 %v2465_v0  ;;  %2139 = vmatprep.subr.bf16.mxu1 %v2465_v0 }
  0x41   :  { %2133 = vmatprep.mubr.msk.bf16.mxu0 %vm2466_vm0, %v2465_v0  ;;  %2141 = vmatprep.mubr.msk.bf16.mxu1 %vm2466_vm0, %v2465_v0 }
  0x47   :  { %2132 = vmatpush3.bf16.xpose.msra.mxu0 %v345_v24  ;;  %2140 = vmatpush3.bf16.xpose.msra.mxu1 %v402_v25 }
  0x48   :  { %2145 = vmatprep.subr.bf16.mxu0 %v2465_v0  ;;  %2153 = vmatprep.subr.bf16.mxu1 %v2465_v0 }
  0x4e   :  { %2134 = vmatmul.mubr.msk.bf16.vlgmr.msra.gmra.mxu0 %vm112_vm1, %v2516_v9  ;;  %2142 = vmatmul.mubr.msk.bf16.vlgmr.msra.gmra.mxu1 %vm112_vm1, %v2516_v9 }
  0x4f   :  { %2146 = vmatpush3.bf16.xpose.msra.mxu0 %v462_v28  ;;  %2154 = vmatpush3.bf16.xpose.msra.mxu1 %v519_v29 }
  0x50   :  { %2147 = vmatprep.subr.bf16.mxu0 %v2465_v0  ;;  %2155 = vmatprep.subr.bf16.mxu1 %v2465_v0 }
  0x51   :  { %2149 = vmatprep.mubr.msk.bf16.mxu0 %vm2466_vm0, %v2465_v0  ;;  %2157 = vmatprep.mubr.msk.bf16.mxu1 %vm2466_vm0, %v2465_v0 }
  0x57   :  { %2148 = vmatpush3.bf16.xpose.msra.mxu0 %v459_v32  ;;  %2156 = vmatpush3.bf16.xpose.msra.mxu1 %v516_v33 }
  0x58   :  { %2161 = vmatprep.subr.bf16.mxu0 %v2465_v0  ;;  %2169 = vmatprep.subr.bf16.mxu1 %v2465_v0 }
  0x5e   :  { %2150 = vmatmul.mubr.msk.bf16.vlgmr.msra.gmra.mxu0 %vm112_vm1, %v2516_v9  ;;  %2158 = vmatmul.mubr.msk.bf16.vlgmr.msra.gmra.mxu1 %vm112_vm1, %v2516_v9 }
  0x5f   :  { %2162 = vmatpush3.bf16.xpose.msra.mxu0 %v576_v35  ;;  %2165 = vmatprep.mubr.msk.bf16.mxu0 %vm2466_vm0, %v2465_v0 }
  0x60   :  { %2163 = vmatprep.subr.bf16.mxu0 %v2465_v0  ;;  %2173 = vmatprep.mubr.msk.bf16.mxu1 %vm2466_vm0, %v2465_v0 }
  0x61   :  { %2170 = vmatpush3.bf16.xpose.msra.mxu1 %v633_v37 }
  0x62   :  { %2171 = vmatprep.subr.bf16.mxu1 %v2465_v0 }
  0x67   :  { %2164 = vmatpush3.bf16.xpose.msra.mxu0 %v573_v39 }
  0x68   :  { %2177 = vmatprep.subr.bf16.mxu0 %v2465_v0 }
  0x69   :  { %2172 = vmatpush3.bf16.xpose.msra.mxu1 %v630_v42 }
  0x6a   :  { %2185 = vmatprep.subr.bf16.mxu1 %v2465_v0 }
  0x6e   :  { %2166 = vmatmul.mubr.msk.bf16.vlgmr.msra.gmra.mxu0 %vm112_vm1, %v2516_v9 }
  0x6f   :  { %2178 = vmatpush3.bf16.xpose.msra.mxu0 %v690_v43  ;;  %2181 = vmatprep.mubr.msk.bf16.mxu0 %vm2466_vm0, %v2465_v0 }
  0x70   :  { %2179 = vmatprep.subr.bf16.mxu0 %v2465_v0  ;;  %2174 = vmatmul.mubr.msk.bf16.vlgmr.msra.gmra.mxu1 %vm112_vm1, %v2516_v9 }
  0x71   :  { %2186 = vmatpush3.bf16.xpose.msra.mxu1 %v747_v45  ;;  %2189 = vmatprep.mubr.msk.bf16.mxu1 %vm2466_vm0, %v2465_v0 }
  0x72   :  { %2187 = vmatprep.subr.bf16.mxu1 %v2465_v0 }
  0x77   :  { %2180 = vmatpush3.bf16.xpose.msra.mxu0 %v687_v47 }
  0x78   :  { %2193 = vmatprep.subr.bf16.mxu0 %v2465_v0 }
  0x79   :  { %2188 = vmatpush3.bf16.xpose.msra.mxu1 %v744_v49 }
  0x7a   :  { %2199 = vmatprep.subr.bf16.mxu1 %v2465_v0 }
  0x7e   :  { %2182 = vmatmul.mubr.msk.bf16.vlgmr.msra.gmra.mxu0 %vm112_vm1, %v2516_v9 }
  0x7f   :  { %2195 = vmatprep.mubr.msk.bf16.mxu0 %vm2466_vm0, %v2465_v0 }
  0x80   :  { %2190 = vmatmul.mubr.msk.bf16.vlgmr.msra.gmra.mxu1 %vm112_vm1, %v2516_v9 }
  0x81   :  { %2201 = vmatprep.mubr.msk.bf16.mxu1 %vm2466_vm0, %v2465_v0 }
  0xee   :  { %v156_v50 = vpop.f32.mrf.mxu0  ;;  %v213_v51 = vpop.f32.mrf.mxu1 }
  0xef   :  { %v790_v16 = vpack.c.bf16 %v156_v50, %v156_v50  ;;  %v792_v22 = vpack.c.bf16 %v213_v51, %v213_v51 }
  0xf0   :  { %v2103_v52 = vpop.f32.mrf.mxu0  ;;  %v2111_v53 = vpop.f32.mrf.mxu1 }
  0xf2   :  { %v159_v54 = vpop.f32.mrf.mxu0  ;;  %v216_v55 = vpop.f32.mrf.mxu1 }
  0xf3   :  { %v791_v19 = vpack.c.bf16 %v159_v54, %v159_v54  ;;  %v793_v29 = vpack.c.bf16 %v216_v55, %v216_v55 }
  0xf4   :  { %v2104_v56 = vpop.f32.mrf.mxu0  ;;  %v2112_v57 = vpop.f32.mrf.mxu1 }
  0xfe   :  { %v2608_v58 = vpop.f32.mrf.mxu0  ;;  %v2610_v59 = vpop.f32.mrf.mxu1 }
  0xff   :  { %v794_v36 = vpack.c.bf16 %v2608_v58, %v2608_v58  ;;  %v796_v41 = vpack.c.bf16 %v2610_v59, %v2610_v59 }
 0x100   :  { %v2119_v60 = vpop.f32.mrf.mxu0  ;;  %v2127_v61 = vpop.f32.mrf.mxu1 }
 0x102   :  { %v2612_v62 = vpop.f32.mrf.mxu0  ;;  %v2614_v63 = vpop.f32.mrf.mxu1 }
 0x103   :  { %v795_v39 = vpack.c.bf16 %v2612_v62, %v2612_v62  ;;  %v797_v42 = vpack.c.bf16 %v2614_v63, %v2614_v63 }
 0x104   :  { %v2120_v1 = vpop.f32.mrf.mxu0  ;;  %v2128_v2 = vpop.f32.mrf.mxu1 }
 0x10e   :  { %v384_v3 = vpop.f32.mrf.mxu0  ;;  %v441_v5 = vpop.f32.mrf.mxu1 }
 0x10f   :  { %v798_v4 = vpack.c.bf16 %v384_v3, %v384_v3  ;;  %v800_v10 = vpack.c.bf16 %v441_v5, %v441_v5 }
 0x110   :  { %v2135_v6 = vpop.f32.mrf.mxu0  ;;  %v2143_v8 = vpop.f32.mrf.mxu1 }
 0x111   :  { %v810_v7 = vsel %vm112_vm1, %v798_v4, 0  ;;  %v902_v17 = vsel %vm112_vm1, %v800_v10, 0 }
 0x112   :  { %v387_v9 = vpop.f32.mrf.mxu0  ;;  %2194 = vmatpush3.bf16.xpose.msra.mxu0 %v810_v7  ;;  %v444_v12 = vpop.f32.mrf.mxu1 }
 0x113   :  { %v799_v11 = vpack.c.bf16 %v387_v9, %v387_v9  ;;  %2205 = vmatprep.subr.bf16.mxu0 %v2465_v0  ;;  %v801_v18 = vpack.c.bf16 %v444_v12, %v444_v12 }
 0x114   :  { %v2136_v13 = vpop.f32.mrf.mxu0  ;;  %v2144_v15 = vpop.f32.mrf.mxu1 }
 0x115   :  { %v856_v14 = vsel %vm112_vm1, %v799_v11, 0  ;;  %v948_v20 = vsel %vm112_vm1, %v801_v18, 0 }
 0x116   :  { %2200 = vmatpush3.bf16.xpose.msra.mxu1 %v856_v14 }
 0x117   :  { %2211 = vmatprep.subr.bf16.mxu1 %v2465_v0 }
 0x119   :  { %2196 = vmatmul.mubr.msk.bf16.vlgmr.msra.gmra.mxu0 %vm112_vm1, %v790_v16 }
 0x11a   :  { %2206 = vmatpush3.bf16.xpose.msra.mxu0 %v902_v17  ;;  %2207 = vmatprep.mubr.msk.bf16.mxu0 %vm2466_vm0, %v2465_v0 }
 0x11b   :  { %2217 = vmatprep.subr.bf16.mxu0 %v2465_v0 }
 0x11d   :  { %2202 = vmatmul.mubr.msk.bf16.vlgmr.msra.gmra.mxu1 %vm112_vm1, %v791_v19 }
 0x11e   :  { %v498_v21 = vpop.f32.mrf.mxu0  ;;  %2212 = vmatpush3.bf16.xpose.msra.mxu1 %v948_v20  ;;  %2213 = vmatprep.mubr.msk.bf16.mxu1 %vm2466_vm0, %v2465_v0  ;;  %v555_v24 = vpop.f32.mrf.mxu1 }
 0x11f   :  { %v802_v23 = vpack.c.bf16 %v498_v21, %v498_v21  ;;  %2223 = vmatprep.subr.bf16.mxu1 %v2465_v0  ;;  %v804_v30 = vpack.c.bf16 %v555_v24, %v555_v24 }
 0x120   :  { %v2151_v25 = vpop.f32.mrf.mxu0  ;;  %v2159_v27 = vpop.f32.mrf.mxu1 }
 0x121   :  { %v994_v26 = vsel %vm112_vm1, %v802_v23, 0  ;;  %2208 = vmatmul.mubr.msk.bf16.vlgmr.msra.gmra.mxu0 %vm112_vm1, %v792_v22  ;;  %v1086_v37 = vsel %vm112_vm1, %v804_v30, 0 }
 0x122   :  { %v501_v28 = vpop.f32.mrf.mxu0  ;;  %2218 = vmatpush3.bf16.xpose.msra.mxu0 %v994_v26  ;;  %2219 = vmatprep.mubr.msk.bf16.mxu0 %vm2466_vm0, %v2465_v0  ;;  %v558_v32 = vpop.f32.mrf.mxu1 }
 0x123   :  { %v803_v31 = vpack.c.bf16 %v501_v28, %v501_v28  ;;  %2229 = vmatprep.subr.bf16.mxu0 %v2465_v0  ;;  %v805_v38 = vpack.c.bf16 %v558_v32, %v558_v32 }
 0x124   :  { %v2152_v33 = vpop.f32.mrf.mxu0  ;;  %v2160_v35 = vpop.f32.mrf.mxu1 }
 0x125   :  { %v1040_v34 = vsel %vm112_vm1, %v803_v31, 0  ;;  %2214 = vmatmul.mubr.msk.bf16.vlgmr.msra.gmra.mxu1 %vm112_vm1, %v793_v29  ;;  %v1132_v40 = vsel %vm112_vm1, %v805_v38, 0 }
 0x126   :  { %2224 = vmatpush3.bf16.xpose.msra.mxu1 %v1040_v34  ;;  %2225 = vmatprep.mubr.msk.bf16.mxu1 %vm2466_vm0, %v2465_v0 }
 0x127   :  { %2235 = vmatprep.subr.bf16.mxu1 %v2465_v0 }
 0x129   :  { %2220 = vmatmul.mubr.msk.bf16.vlgmr.msra.gmra.mxu0 %vm112_vm1, %v794_v36 }
 0x12a   :  { %2230 = vmatpush3.bf16.xpose.msra.mxu0 %v1086_v37  ;;  %2231 = vmatprep.mubr.msk.bf16.mxu0 %vm2466_vm0, %v2465_v0 }
 0x12b   :  { %2241 = vmatprep.subr.bf16.mxu0 %v2465_v0 }
 0x12d   :  { %2226 = vmatmul.mubr.msk.bf16.vlgmr.msra.gmra.mxu1 %vm112_vm1, %v795_v39 }
 0x12e   :  { %2236 = vmatpush3.bf16.xpose.msra.mxu1 %v1132_v40  ;;  %2237 = vmatprep.mubr.msk.bf16.mxu1 %vm2466_vm0, %v2465_v0  ;;  %v612_v43 = vpop.f32.mrf.mxu0 }
 0x12f   :  { %2247 = vmatprep.subr.bf16.mxu1 %v2465_v0  ;;  %v1271_v44 = vpack.c.bf16 %v612_v43, %v612_v43 }
 0x130   :  { %v2167_v45 = vpop.f32.mrf.mxu0  ;;  %v669_v48 = vpop.f32.mrf.mxu1 }
 0x131   :  { %2232 = vmatmul.mubr.msk.bf16.vlgmr.msra.gmra.mxu0 %vm112_vm1, %v796_v41  ;;  %v1284_v46 = vsel %vm1282_vm2, %v1271_v44, 0  ;;  %v1273_v50 = vpack.c.bf16 %v669_v48, %v669_v48 }
 0x132   :  { %2243 = vmatprep.mubr.msk.bf16.mxu0 %vm2466_vm0, %v2465_v0  ;;  %v615_v47 = vpop.f32.mrf.mxu0  ;;  %2242 = vmatpush3.bf16.msra.mxu0 %v1284_v46  ;;  %v2175_v52 = vpop.f32.mrf.mxu1 }
 0x133   :  { %v1272_v49 = vpack.c.bf16 %v615_v47, %v615_v47  ;;  %2253 = vmatprep.subr.bf16.mxu0 %v2465_v0  ;;  %v2668_v54 = vsel %vm1282_vm2, %v1273_v50, 0 }
 0x134   :  { %v2168_v51 = vpop.f32.mrf.mxu0  ;;  %v672_v55 = vpop.f32.mrf.mxu1 }
 0x135   :  { %2238 = vmatmul.mubr.msk.bf16.vlgmr.msra.gmra.mxu1 %vm112_vm1, %v797_v42  ;;  %v1330_v53 = vsel %vm1282_vm2, %v1272_v49, 0  ;;  %v1274_v56 = vpack.c.bf16 %v672_v55, %v672_v55 }
 0x136   :  { %2249 = vmatprep.mubr.msk.bf16.mxu1 %vm2466_vm0, %v2465_v0  ;;  %2248 = vmatpush3.bf16.msra.mxu1 %v1330_v53  ;;  %v2176_v57 = vpop.f32.mrf.mxu1 }
 0x137   :  { %2259 = vmatprep.subr.bf16.mxu1 %v2465_v0  ;;  %v2672_v58 = vsel %vm1282_vm2, %v1274_v56, 0 }
 0x13e   :  { %v726_v59 = vpop.f32.mrf.mxu0 }
 0x13f   :  { %v1275_v60 = vpack.c.bf16 %v726_v59, %v726_v59 }
 0x140   :  { %v2183_v61 = vpop.f32.mrf.mxu0  ;;  %v783_v1 = vpop.f32.mrf.mxu1 }
 0x141   :  { %v2675_v62 = vsel %vm1282_vm2, %v1275_v60, 0  ;;  %v1277_v3 = vpack.c.bf16 %v783_v1, %v783_v1 }
 0x142   :  { %v729_v63 = vpop.f32.mrf.mxu0  ;;  %v2191_v5 = vpop.f32.mrf.mxu1 }
 0x143   :  { %v1276_v2 = vpack.c.bf16 %v729_v63, %v729_v63  ;;  %v2681_v7 = vsel %vm1282_vm2, %v1277_v3, 0 }
 0x144   :  { %v2184_v4 = vpop.f32.mrf.mxu0  ;;  %v786_v8 = vpop.f32.mrf.mxu1 }
 0x145   :  { %v2678_v6 = vsel %vm1282_vm2, %v1276_v2, 0  ;;  %v1278_v9 = vpack.c.bf16 %v786_v8, %v786_v8 }
 0x146   :  { %v2192_v10 = vpop.f32.mrf.mxu1 }
 0x147   :  { %v2684_v11 = vsel %vm1282_vm2, %v1278_v9, 0 }
 0x1d9   :  { %v846_v12 = vpop.f32.mrf.mxu0 }
 0x1da   :  { %v1175_v13 = vsel %vm1174_vm3, %v846_v12, -inf }
 0x1db   :  { %1176 = vmax.xlane.f32.xlu0 %v1175_v13  ;;  %v2197_v14 = vpop.f32.mrf.mxu0 }
 0x1dd   :  { %v849_v15 = vpop.f32.mrf.mxu0  ;;  %v892_v16 = vpop.f32.mrf.mxu1 }
 0x1de   :  { %v1178_v17 = vsel %vm1174_vm3, %v892_v16, -inf }
 0x1df   :  { %v2203_v18 = vpop.f32.mrf.mxu1  ;;  %1179 = vmax.xlane.f32.xlu0 %v1178_v17  ;;  %v2198_v19 = vpop.f32.mrf.mxu0 }
 0x1e1   :  { %v895_v20 = vpop.f32.mrf.mxu1  ;;  %v938_v21 = vpop.f32.mrf.mxu0 }
 0x1e2   :  { %v1181_v22 = vsel %vm1174_vm3, %v938_v21, -inf }
 0x1e3   :  { %v2204_v23 = vpop.f32.mrf.mxu1  ;;  %1182 = vmax.xlane.f32.xlu1 %v1181_v22  ;;  %v2209_v24 = vpop.f32.mrf.mxu0 }
 0x1e5   :  { %v941_v25 = vpop.f32.mrf.mxu0  ;;  %v984_v26 = vpop.f32.mrf.mxu1 }
 0x1e6   :  { %v1184_v27 = vsel %vm1174_vm3, %v984_v26, -inf }
 0x1e7   :  { %v2215_v28 = vpop.f32.mrf.mxu1  ;;  %1185 = vmax.xlane.f32.xlu1 %v1184_v27  ;;  %v2210_v29 = vpop.f32.mrf.mxu0 }
 0x1e9   :  { %v987_v30 = vpop.f32.mrf.mxu1  ;;  %v1030_v31 = vpop.f32.mrf.mxu0 }
 0x1ea   :  { %v1187_v32 = vsel %vm1174_vm3, %v1030_v31, -inf }
 0x1eb   :  { %v2216_v33 = vpop.f32.mrf.mxu1  ;;  %1188 = vmax.xlane.f32.xlu0 %v1187_v32  ;;  %v2221_v34 = vpop.f32.mrf.mxu0 }
 0x1ed   :  { %v1033_v35 = vpop.f32.mrf.mxu0  ;;  %v1076_v36 = vpop.f32.mrf.mxu1 }
 0x1ee   :  { %v1190_v37 = vsel %vm1174_vm3, %v1076_v36, -inf }
 0x1ef   :  { %v2227_v38 = vpop.f32.mrf.mxu1  ;;  %1191 = vmax.xlane.f32.xlu1 %v1190_v37  ;;  %v2222_v39 = vpop.f32.mrf.mxu0 }
 0x1f1   :  { %v1079_v40 = vpop.f32.mrf.mxu1  ;;  %v1122_v41 = vpop.f32.mrf.mxu0 }
 0x1f2   :  { %v1193_v42 = vsel %vm1174_vm3, %v1122_v41, -inf }
 0x1f3   :  { %v2228_v43 = vpop.f32.mrf.mxu1  ;;  %1194 = vmax.xlane.f32.xlu0 %v1193_v42  ;;  %v2233_v44 = vpop.f32.mrf.mxu0 }
 0x1f5   :  { %v1125_v45 = vpop.f32.mrf.mxu0  ;;  %v1168_v46 = vpop.f32.mrf.mxu1 }
 0x1f6   :  { %v1196_v47 = vsel %vm1174_vm3, %v1168_v46, -inf }
 0x1f7   :  { %v2239_v48 = vpop.f32.mrf.mxu1  ;;  %1197 = vmax.xlane.f32.xlu1 %v1196_v47  ;;  %v2234_v49 = vpop.f32.mrf.mxu0 }
 0x1f9   :  { %v1171_v50 = vpop.f32.mrf.mxu1 }
 0x1fb   :  { %v2240_v51 = vpop.f32.mrf.mxu1 }
 0x264   :  { %v1177_v52 = vpop.xlane.xlu0 %1176 }
 0x265   :  { %v1199_v53 = vsub.f32 %v846_v12, %v1177_v52 }
 0x267   :  { %v1207_v55 = vmul.f32 1.442695, %v1199_v53 }
 0x268   :  { %v1180_v56 = vpop.xlane.xlu0 %1179 }
 0x269   :  { %2363 = vpow2.f32 %v1207_v55  ;;  %v1200_v57 = vsub.f32 %v892_v16, %v1180_v56 }
 0x26b   :  { %v1209_v59 = vmul.f32 1.442695, %v1200_v57 }
 0x26c   :  { %v1183_v60 = vpop.xlane.xlu1 %1182 }
 0x26d   :  { %2365 = vpow2.f32 %v1209_v59  ;;  %v1201_v61 = vsub.f32 %v938_v21, %v1183_v60  ;;  %v2355_v60 = vld [vmem:[#allocation5 + $0x8] sm:$0xff]  }
 0x26f   :  { %v1211_v63 = vmul.f32 1.442695, %v1201_v61 }
 0x270   :  { %v1186_v1 = vpop.xlane.xlu1 %1185 }
 0x271   :  { %2367 = vpow2.f32 %v1211_v63  ;;  %v1202_v2 = vsub.f32 %v984_v26, %v1186_v1 }
 0x273   :  { %v1213_v3 = vmul.f32 1.442695, %v1202_v2 }
 0x274   :  { %v1189_v4 = vpop.xlane.xlu0 %1188 }
 0x275   :  { %2369 = vpow2.f32 %v1213_v3  ;;  %v1203_v5 = vsub.f32 %v1030_v31, %v1189_v4  ;;  %v2357_v4 = vld [vmem:[#allocation5 + $0x18] sm:$0xff]  }
 0x276   :  { %v2364_v8 = vpop.eup %2363 }
 0x277   :  { %v1215_v9 = vmul.f32 1.442695, %v1203_v5  ;;  %v1223_v10 = vsel %vm1174_vm3, %v2364_v8, 0.0 }
 0x278   :  { %v1192_v12 = vpop.xlane.xlu1 %1191  ;;  %1224 = vadd.xlane.f32.xlu0 %v1223_v10 }
 0x279   :  { %2371 = vpow2.f32 %v1215_v9  ;;  %v1204_v13 = vsub.f32 %v1076_v36, %v1192_v12  ;;  %v2358_v9 = vld [vmem:[#allocation5 + $0x10] sm:$0xff]  }
 0x27a   :  { %v2366_v14 = vpop.eup %2365  ;;  %v1742_v10 = vsel %vm112_vm1, %v2358_v9, 0 }
 0x27b   :  { %v1217_v15 = vmul.f32 1.442695, %v1204_v13  ;;  %v1226_v16 = vsel %vm1174_vm3, %v2366_v14, 0.0  ;;  %v2359_v13 = vld [vmem:[#allocation5 + $0x28] sm:$0xff]  }
 0x27c   :  { %1227 = vadd.xlane.f32.xlu1 %v1226_v16  ;;  %v1195_v17 = vpop.xlane.xlu0 %1194 }
 0x27d   :  { %2373 = vpow2.f32 %v1217_v15  ;;  %v1205_v18 = vsub.f32 %v1122_v41, %v1195_v17 }
 0x27e   :  { %v2368_v19 = vpop.eup %2367 }
 0x27f   :  { %v1219_v20 = vmul.f32 1.442695, %v1205_v18  ;;  %v1229_v21 = vsel %vm1174_vm3, %v2368_v19, 0.0  ;;  %v1805_v18 = vsel %vm112_vm1, %v2359_v13, 0 }
 0x280   :  { %v1198_v22 = vpop.xlane.xlu1 %1197  ;;  %1230 = vadd.xlane.f32.xlu0 %v1229_v21 }
 0x281   :  { %2375 = vpow2.f32 %v1219_v20  ;;  %v1206_v23 = vsub.f32 %v1168_v46, %v1198_v22 }
 0x282   :  { %v2370_v24 = vpop.eup %2369 }
 0x283   :  { %v1221_v25 = vmul.f32 1.442695, %v1206_v23  ;;  %v1232_v26 = vsel %vm1174_vm3, %v2370_v24, 0.0  ;;  %v2360_v23 = vld [vmem:[#allocation5 + $0x20] sm:$0xff]  }
 0x284   :  { %1233 = vadd.xlane.f32.xlu1 %v1232_v26 }
 0x285   :  { %2377 = vpow2.f32 %v1221_v25 }
 0x286   :  { %v2372_v27 = vpop.eup %2371 }
 0x287   :  { %v1235_v28 = vsel %vm1174_vm3, %v2372_v27, 0.0 }
 0x288   :  { %1236 = vadd.xlane.f32.xlu0 %v1235_v28 }
 0x28a   :  { %v2374_v29 = vpop.eup %2373 }
 0x28b   :  { %v1238_v30 = vsel %vm1174_vm3, %v2374_v29, 0.0 }
 0x28c   :  { %1239 = vadd.xlane.f32.xlu1 %v1238_v30  ;;  %v1802_v30 = vsel %vm112_vm1, %v2360_v23, 0 }
 0x28e   :  { %v2700_v31 = vpop.eup %2375 }
 0x28f   :  { %v1241_v32 = vsel %vm1174_vm3, %v2700_v31, 0.0 }
 0x290   :  { %1242 = vadd.xlane.f32.xlu0 %v1241_v32 }
 0x292   :  { %v2704_v33 = vpop.eup %2377 }
 0x293   :  { %v1244_v34 = vsel %vm1174_vm3, %v2704_v33, 0.0 }
 0x294   :  { %1245 = vadd.xlane.f32.xlu1 %v1244_v34 }
 0x301   :  { %v1225_v35 = vpop.xlane.xlu0 %1224 }
 0x302   :  { %2379 = vrcp.f32 %v1225_v35 }
 0x305   :  { %v1228_v36 = vpop.xlane.xlu1 %1227 }
 0x306   :  { %2381 = vrcp.f32 %v1228_v36  ;;  %v2362_v36 = vld [vmem:[#allocation5 + $0x30] sm:$0xff]  }
 0x309   :  { %v1231_v37 = vpop.xlane.xlu0 %1230 }
 0x30a   :  { %2383 = vrcp.f32 %v1231_v37 }
 0x30d   :  { %v1234_v38 = vpop.xlane.xlu1 %1233 }
 0x30e   :  { %2385 = vrcp.f32 %v1234_v38 }
 0x30f   :  { %v2380_v39 = vpop.eup %2379 }
 0x310   :  { %v1255_v40 = vmul.f32 %v2380_v39, %v2364_v8  ;;  %v1745_v8 = vsel %vm112_vm1, %v2357_v4, 0 }
 0x311   :  { %v1237_v41 = vpop.xlane.xlu0 %1236 }
 0x312   :  { %2387 = vrcp.f32 %v1237_v41  ;;  %v1263_v42 = vpack.c.bf16 %v1255_v40, %v1255_v40 }
 0x313   :  { %v2382_v43 = vpop.eup %2381 }
 0x314   :  { %2244 = vmatmul.mubr.msk.bf16.vlgmr.msra.gmra.mxu0 %vm1174_vm3, %v1263_v42  ;;  %v1256_v44 = vmul.f32 %v2382_v43, %v2366_v14  ;;  %v1862_v42 = vsel %vm112_vm1, %v2362_v36, 0 }
 0x315   :  { %2254 = vmatpush3.bf16.msra.mxu0 %v2668_v54  ;;  %v1240_v45 = vpop.xlane.xlu1 %1239  ;;  %2255 = vmatprep.mubr.msk.bf16.mxu0 %vm2466_vm0, %v2465_v0 }
 0x316   :  { %2389 = vrcp.f32 %v1240_v45  ;;  %v1264_v46 = vpack.c.bf16 %v1256_v44, %v1256_v44  ;;  %2265 = vmatprep.subr.bf16.mxu0 %v2465_v0 }
 0x317   :  { %v2384_v47 = vpop.eup %2383 }
 0x318   :  { %2250 = vmatmul.mubr.msk.bf16.vlgmr.msra.gmra.mxu1 %vm1174_vm3, %v1264_v46  ;;  %v1257_v48 = vmul.f32 %v2384_v47, %v2368_v19 }
 0x319   :  { %2260 = vmatpush3.bf16.msra.mxu1 %v2672_v58  ;;  %v1243_v49 = vpop.xlane.xlu0 %1242  ;;  %2261 = vmatprep.mubr.msk.bf16.mxu1 %vm2466_vm0, %v2465_v0 }
 0x31a   :  { %2391 = vrcp.f32 %v1243_v49  ;;  %v1265_v54 = vpack.c.bf16 %v1257_v48, %v1257_v48  ;;  %2271 = vmatprep.subr.bf16.mxu1 %v2465_v0 }
 0x31b   :  { %v2386_v50 = vpop.eup %2385 }
 0x31c   :  { %2256 = vmatmul.mubr.msk.bf16.vlgmr.msra.gmra.mxu0 %vm1174_vm3, %v1265_v54  ;;  %v1258_v51 = vmul.f32 %v2386_v50, %v2370_v24  ;;  %v2361_v24 = vld [vmem:[#allocation5 + $0x38] sm:$0xff]  }
 0x31d   :  { %2266 = vmatpush3.bf16.msra.mxu0 %v2675_v62  ;;  %v1246_v52 = vpop.xlane.xlu1 %1245  ;;  %2267 = vmatprep.mubr.msk.bf16.mxu0 %vm2466_vm0, %v2465_v0 }
 0x31e   :  { %2393 = vrcp.f32 %v1246_v52  ;;  %v1266_v58 = vpack.c.bf16 %v1258_v51, %v1258_v51  ;;  %2277 = vmatprep.subr.bf16.mxu0 %v2465_v0 }
 0x31f   :  { %v2388_v53 = vpop.eup %2387 }
 0x320   :  { %2262 = vmatmul.mubr.msk.bf16.vlgmr.msra.gmra.mxu1 %vm1174_vm3, %v1266_v58  ;;  %v1259_v55 = vmul.f32 %v2388_v53, %v2372_v27 }
 0x321   :  { %2272 = vmatpush3.bf16.msra.mxu1 %v2678_v6  ;;  %2273 = vmatprep.mubr.msk.bf16.mxu1 %vm2466_vm0, %v2465_v0 }
 0x322   :  { %v1267_v56 = vpack.c.bf16 %v1259_v55, %v1259_v55  ;;  %2283 = vmatprep.subr.bf16.mxu1 %v2465_v0 }
 0x323   :  { %v2390_v62 = vpop.eup %2389 }
 0x324   :  { %2268 = vmatmul.mubr.msk.bf16.vlgmr.msra.gmra.mxu0 %vm1174_vm3, %v1267_v56  ;;  %v1260_v57 = vmul.f32 %v2390_v62, %v2374_v29 }
 0x325   :  { %2278 = vmatpush3.bf16.msra.mxu0 %v2681_v7  ;;  %2279 = vmatprep.mubr.msk.bf16.mxu0 %vm2466_vm0, %v2465_v0  ;;  %v1685_v7 = vsel %vm112_vm1, %v2355_v60, 0 }
 0x326   :  { %v1268_v59 = vpack.c.bf16 %v1260_v57, %v1260_v57  ;;  %2289 = vmatprep.subr.bf16.mxu0 %v2465_v0 }
 0x327   :  { %v2392_v6 = vpop.eup %2391 }
 0x328   :  { %2274 = vmatmul.mubr.msk.bf16.vlgmr.msra.gmra.mxu1 %vm1174_vm3, %v1268_v59  ;;  %v1261_v61 = vmul.f32 %v2392_v6, %v2700_v31  ;;  %v1865_v31 = vsel %vm112_vm1, %v2361_v24, 0 }
 0x329   :  { %2284 = vmatpush3.bf16.msra.mxu1 %v2684_v11  ;;  %2285 = vmatprep.mubr.msk.bf16.mxu1 %vm2466_vm0, %v2465_v0  ;;  %v2356_v11 = vld [vmem:[#allocation5] sm:$0xff]  }
 0x32a   :  { %v1269_v63 = vpack.c.bf16 %v1261_v61, %v1261_v61  ;;  %2297 = vmatprep.subr.bf16.mxu1 %v2465_v0  ;;  %v1682_v5 = vsel %vm112_vm1, %v2356_v11, 0 }
 0x32b   :  { %v2394_v1 = vpop.eup %2393 }
 0x32c   :  { %2280 = vmatmul.mubr.msk.bf16.vlgmr.msra.gmra.mxu0 %vm1174_vm3, %v1269_v63  ;;  %v1262_v2 = vmul.f32 %v2394_v1, %v2704_v33 }
 0x32d   :  { %2290 = vmatpush3.bf16.xpose.msra.mxu0 %v1685_v7  ;;  %2293 = vmatprep.mubr.msk.bf16.mxu0 %vm2466_vm0, %v2465_v0 }
 0x32e   :  { %v1270_v3 = vpack.c.bf16 %v1262_v2, %v1262_v2  ;;  %2291 = vmatprep.subr.bf16.mxu0 %v2465_v0 }
 0x330   :  { %2286 = vmatmul.mubr.msk.bf16.vlgmr.msra.gmra.mxu1 %vm1174_vm3, %v1270_v3 }
 0x331   :  { %2301 = vmatprep.mubr.msk.bf16.mxu1 %vm2466_vm0, %v2465_v0  ;;  %2298 = vmatpush3.bf16.xpose.msra.mxu1 %v1745_v8 }
 0x332   :  { %2299 = vmatprep.subr.bf16.mxu1 %v2465_v0 }
 0x335   :  { %2292 = vmatpush3.bf16.xpose.msra.mxu0 %v1682_v5 }
 0x336   :  { %2305 = vmatprep.subr.bf16.mxu0 %v2465_v0 }
 0x339   :  { %2300 = vmatpush3.bf16.xpose.msra.mxu1 %v1742_v10 }
 0x33a   :  { %2313 = vmatprep.subr.bf16.mxu1 %v2465_v0 }
 0x3d4   :  { %v1320_v12 = vpop.f32.mrf.mxu0 }
 0x3d6   :  { %v2245_v14 = vpop.f32.mrf.mxu0 }
 0x3d7   :  { %v2016_v14 = vld [vmem:[%s2787_s3] ss:$0 sm:$0xff] }
 0x3d8   :  { %v1323_v15 = vpop.f32.mrf.mxu0  ;;  %v1366_v16 = vpop.f32.mrf.mxu1 }
 0x3d9   :  { %v1648_v17 = vpack.c.bf16 %v1366_v16, %v1320_v12 }
 0x3da   :  { %v2246_v19 = vpop.f32.mrf.mxu0  ;;  %v2251_v20 = vpop.f32.mrf.mxu1 }
 0x3db   :  { %2294 = vmatmul.mubr.msk.bf16.vlgmr.msra.gmra.mxu0 %vm112_vm1, %v1648_v17 }
 0x3dc   :  { %v1369_v21 = vpop.f32.mrf.mxu1  ;;  %v1412_v22 = vpop.f32.mrf.mxu0  ;;  %2306 = vmatpush3.bf16.xpose.msra.mxu0 %v1805_v18  ;;  %2309 = vmatprep.mubr.msk.bf16.mxu0 %vm2466_vm0, %v2465_v0 }
 0x3dd   :  { %2307 = vmatprep.subr.bf16.mxu0 %v2465_v0 }
 0x3de   :  { %v2252_v25 = vpop.f32.mrf.mxu1  ;;  %v2257_v26 = vpop.f32.mrf.mxu0 }
 0x3e0   :  { %v1415_v27 = vpop.f32.mrf.mxu0  ;;  %v1458_v28 = vpop.f32.mrf.mxu1 }
 0x3e1   :  { %v1649_v29 = vpack.c.bf16 %v1458_v28, %v1412_v22 }
 0x3e2   :  { %v2258_v32 = vpop.f32.mrf.mxu0  ;;  %v2263_v33 = vpop.f32.mrf.mxu1 }
 0x3e3   :  { %2302 = vmatmul.mubr.msk.bf16.vlgmr.msra.gmra.mxu1 %vm112_vm1, %v1649_v29 }
 0x3e4   :  { %v1461_v34 = vpop.f32.mrf.mxu1  ;;  %v1504_v35 = vpop.f32.mrf.mxu0  ;;  %2308 = vmatpush3.bf16.xpose.msra.mxu0 %v1802_v30  ;;  %2314 = vmatpush3.bf16.xpose.msra.mxu1 %v1865_v31 }
 0x3e5   :  { %2315 = vmatprep.subr.bf16.mxu1 %v2465_v0  ;;  %2317 = vmatprep.mubr.msk.bf16.mxu1 %vm2466_vm0, %v2465_v0 }
 0x3e6   :  { %v2264_v37 = vpop.f32.mrf.mxu1  ;;  %v2269_v38 = vpop.f32.mrf.mxu0 }
 0x3e8   :  { %v1507_v39 = vpop.f32.mrf.mxu0  ;;  %v1550_v40 = vpop.f32.mrf.mxu1 }
 0x3e9   :  { %v1650_v41 = vpack.c.bf16 %v1550_v40, %v1504_v35 }
 0x3ea   :  { %v2270_v43 = vpop.f32.mrf.mxu0  ;;  %v2275_v44 = vpop.f32.mrf.mxu1 }
 0x3eb   :  { %2310 = vmatmul.mubr.msk.bf16.vlgmr.msra.gmra.mxu0 %vm112_vm1, %v1650_v41 }
 0x3ec   :  { %v1553_v45 = vpop.f32.mrf.mxu1  ;;  %v1596_v46 = vpop.f32.mrf.mxu0  ;;  %2316 = vmatpush3.bf16.xpose.msra.mxu1 %v1862_v42 }
 0x3ee   :  { %v2276_v47 = vpop.f32.mrf.mxu1  ;;  %v2281_v48 = vpop.f32.mrf.mxu0 }
 0x3f0   :  { %v1599_v49 = vpop.f32.mrf.mxu0  ;;  %v1642_v54 = vpop.f32.mrf.mxu1 }
 0x3f1   :  { %v1651_v50 = vpack.c.bf16 %v1642_v54, %v1596_v46 }
 0x3f2   :  { %v2282_v0 = vpop.f32.mrf.mxu0  ;;  %v2287_v51 = vpop.f32.mrf.mxu1 }
 0x3f3   :  { %2318 = vmatmul.mubr.msk.bf16.vlgmr.msra.gmra.mxu1 %vm112_vm1, %v1651_v50 }
 0x3f4   :  { %v1645_v52 = vpop.f32.mrf.mxu1 }
 0x3f6   :  { %v2288_v58 = vpop.f32.mrf.mxu1 }
 0x49b   :  { %v1721_v53 = vpop.f32.mrf.mxu0 }
 0x49c   :  { %v1908_v2 = vsel %vm112_vm1, %v1721_v53, 0.0 }
 0x49d   :  { %v2295_v55 = vpop.f32.mrf.mxu0 }
 0x49f   :  { %v1724_v56 = vpop.f32.mrf.mxu0 }
 0x4a0   :  { %v1915_v10 = vsel %vm112_vm1, %v1724_v56, 0.0 }
 0x4a1   :  { %v2296_v62 = vpop.f32.mrf.mxu0 }
 0x4a3   :  { %v1781_v57 = vpop.f32.mrf.mxu1 }
 0x4a4   :  { %v1909_v7 = vsel %vm112_vm1, %v1781_v57, 0.0 }
 0x4a5   :  { %v2303_v59 = vpop.f32.mrf.mxu1  ;;  %v1910_v11 = vadd.f32 %v1909_v7, %v1908_v2 }
 0x4a7   :  { %v1784_v60 = vpop.f32.mrf.mxu1 }
 0x4a8   :  { %v1916_v5 = vsel %vm112_vm1, %v1784_v60, 0.0 }
 0x4a9   :  { %v2304_v6 = vpop.f32.mrf.mxu1  ;;  %v1917_v15 = vadd.f32 %v1916_v5, %v1915_v10 }
 0x4ab   :  { %v1841_v61 = vpop.f32.mrf.mxu0 }
 0x4ac   :  { %v1911_v3 = vsel %vm112_vm1, %v1841_v61, 0.0 }
 0x4ad   :  { %v2311_v63 = vpop.f32.mrf.mxu0  ;;  %v1912_v8 = vadd.f32 %v1911_v3, %v1910_v11 }
 0x4af   :  { %v1844_v1 = vpop.f32.mrf.mxu0 }
 0x4b0   :  { %v1918_v12 = vsel %vm112_vm1, %v1844_v1, 0.0 }
 0x4b1   :  { %v2312_v4 = vpop.f32.mrf.mxu0  ;;  %v1919_v18 = vadd.f32 %v1918_v12, %v1917_v15 }
 0x4b3   :  { %v1901_v9 = vpop.f32.mrf.mxu1 }
 0x4b4   :  { %v1913_v13 = vsel %vm112_vm1, %v1901_v9, 0.0 }
 0x4b5   :  { %v1914_v16 = vadd.f32 %v1913_v13, %v1912_v8  ;;  %v2319_v17 = vpop.f32.mrf.mxu1 }
 0x4b7   :  { %v1929_v19 = vadd.f32 %v2016_v14, %v1914_v16  ;;  %v1904_v20 = vpop.f32.mrf.mxu1 }
 0x4b8   :  { %v1920_v21 = vsel %vm112_vm1, %v1904_v20, 0.0 }
 0x4b9   :  { %1931 = vst.msk [vmem:[#allocation7] sm:$0xff] %vm112_vm1, %v1929_v19  ;;  %v1921_v22 = vadd.f32 %v1920_v21, %v1919_v18  ;;  %v2320_v23 = vpop.f32.mrf.mxu1 }
 0x4bb   :  { %v1930_v24 = vadd.f32 %v2016_v14, %v1921_v22 }
 0x4bd   :  { %1932 = vst.msk [vmem:[#allocation7 + $0x8] sm:$0xff] %vm112_vm1, %v1930_v24 }
 0x4be   :  { %2446 = shalt.err (!%p2443_p0)
}
 0x4bf   :  { %s2468_s3 = smov 128   ;;  %s2469_s5 = smov 8  }
 0x4c0   :  { %1944 = dma.vmem_to_hbm [thread:$0]  %s1939_s29, 256, %s2788_s4, [#allocation4], %s2468_s3, %s2468_s3, %s2469_s5  }
 0x4c1   :  { %2459 = dma.done.wait [#allocation4], 256  }
 0x4c2   :  { %2460 = vsyncadd [#allocation4], 4294967040 }
 0x4c3   :  { %1948 = vsyncpa [#allocation3], 1 }
 0x4c4   :  { %1949 = vsyncpa [#allocation6], 1 }
 0x4c5   :  { %1950 = vsyncpa [#allocation4], 1 }

</bundles_post_ra>
